<compile_context>
chip_gen: v7x
topology: tpu7x:2x2x1
jax: 0.10.0
libtpu: 0.0.40
codegen_flags: <defaults>
</compile_context>

<pallas_src>
import functools

import jax
import jax.numpy as jnp
from jax import lax
from jax.experimental import pallas as pl
from jax.experimental.pallas import tpu as pltpu

_LANE = 128
_SUBLANE = 8
_VMEM_LIMIT = 32 * 1024 * 1024  # explicit budget, safe on v5e/v6e/v7x


def _round_up(v, m):
    return ((v + m - 1) // m) * m


# --------------------------------------------------------------------------- #
# Kernel 1: masked mean pooling (sentence embeddings) + per-row squared norms  #
# --------------------------------------------------------------------------- #
def _pool_kernel(tok_ref, mask_ref, emb_ref, x2_ref):
    tok = tok_ref[...].astype(jnp.float32)             # (TN, L, Hp) bf16 -> f32
    mask = mask_ref[...]                               # (TN, L)     f32
    masked = tok * mask[:, :, None]                    # lanes = Hp, sublanes = L
    summed = jnp.sum(masked, axis=1)                   # (TN, Hp) sublane reduce
    counts = jnp.sum(mask, axis=1, keepdims=True)      # (TN, 1)
    inv_cnt = pl.reciprocal(jnp.maximum(counts, 1e-9), approx=True)   # EUP
    emb = summed * inv_cnt                             # (TN, Hp)
    emb_ref[...] = emb
    x2_ref[...] = jnp.sum(emb * emb, axis=1, keepdims=True)           # (TN, 1)


def _masked_mean_pool(tok_p, mask_p, tn_rows):
    n_pad, seq_len, h_pad = tok_p.shape
    return pl.pallas_call(
        _pool_kernel,
        out_shape=(jax.ShapeDtypeStruct((n_pad, h_pad), jnp.float32),
                   jax.ShapeDtypeStruct((n_pad, 1), jnp.float32)),
        grid_spec=pltpu.PrefetchScalarGridSpec(
            num_scalar_prefetch=0,
            grid=(n_pad // tn_rows,),
            in_specs=[
                pl.BlockSpec((tn_rows, seq_len, h_pad), lambda i: (i, 0, 0)),
                pl.BlockSpec((tn_rows, seq_len), lambda i: (i, 0)),
            ],
            out_specs=[
                pl.BlockSpec((tn_rows, h_pad), lambda i: (i, 0)),
                pl.BlockSpec((tn_rows, 1), lambda i: (i, 0)),
            ],
        ),
        compiler_params=pltpu.CompilerParams(
            dimension_semantics=("parallel",),
            vmem_limit_bytes=_VMEM_LIMIT),
    )(tok_p, mask_p)


# --------------------------------------------------------------------------- #
# Kernel 2: one DKM iteration (distances, softmax, centroid update)            #
# --------------------------------------------------------------------------- #
def _dkm_step_kernel(x_ref, x2_ref, rmask_ref, ct_ref, c2_ref,
                     a_ref, cnew_ref, numer_acc, asum_acc,
                     *, inv_temp, eps):
    i = pl.program_id(0)

    @pl.when(i == 0)
    def _init():
        numer_acc[...] = jnp.zeros_like(numer_acc)
        asum_acc[...] = jnp.zeros_like(asum_acc)

    x = x_ref[...]            # (TM, Hp) f32 embeddings (padded rows are zero)
    x2 = x2_ref[...]          # (TM, 1)  ||x_i||^2 (precomputed in pooling pass)
    rmask = rmask_ref[...]    # (TM, 1)  1.0 for real rows, 0.0 for padded rows
    ct = ct_ref[...]          # (Hp, Kp) centroids in transposed layout
    c2 = c2_ref[...]          # (1, Kp)  ||c_j||^2 (+1e30 on padded cluster lanes)

    # -cdist(X, C) via the Gram trick; centroids are pre-transposed so this is a
    # plain (TM,Hp)x(Hp,Kp) MXU pass with no in-kernel transpose.
    gram = jnp.dot(x, ct, preferred_element_type=jnp.float32)       # (TM, Kp)
    d2 = jnp.maximum(x2 + c2 - 2.0 * gram, 0.0)
    logits = -jnp.sqrt(d2) * inv_temp                               # d / temp

    # softmax over clusters; padded cluster lanes carry -huge logits -> exactly 0
    m = jnp.max(logits, axis=1, keepdims=True)
    e = jnp.exp(logits - m)
    denom = jnp.sum(e, axis=1, keepdims=True)
    a = e * pl.reciprocal(denom, approx=True)                       # EUP recip
    a = a * rmask                                                   # drop padded rows
    a_ref[...] = a                                                  # lane-dense store

    # accumulate X^T @ a (centroid numerator, transposed layout) + cluster mass
    numer_acc[...] += lax.dot_general(
        x, a, dimension_numbers=(((0,), (0,)), ((), ())),
        preferred_element_type=jnp.float32)                         # (Hp, Kp)
    asum_acc[...] += jnp.sum(a, axis=0, keepdims=True)              # (1, Kp)

    @pl.when(i == pl.num_programs(0) - 1)
    def _finalize():
        cnew_ref[...] = numer_acc[...] / (asum_acc[...] + eps)


def _dkm_step(x_pad, x2, rmask, c_t, c2, *, temp, eps, tn_rows):
    n_pad, h_pad = x_pad.shape
    k_pad = c_t.shape[1]
    kernel = functools.partial(_dkm_step_kernel,
                               inv_temp=float(1.0 / temp), eps=float(eps))
    return pl.pallas_call(
        kernel,
        out_shape=(jax.ShapeDtypeStruct((n_pad, k_pad), jnp.float32),
                   jax.ShapeDtypeStruct((h_pad, k_pad), jnp.float32)),
        grid_spec=pltpu.PrefetchScalarGridSpec(
            num_scalar_prefetch=0,
            grid=(n_pad // tn_rows,),
            in_specs=[
                pl.BlockSpec((tn_rows, h_pad), lambda i: (i, 0)),
                pl.BlockSpec((tn_rows, 1), lambda i: (i, 0)),
                pl.BlockSpec((tn_rows, 1), lambda i: (i, 0)),
                pl.BlockSpec((h_pad, k_pad), lambda i: (0, 0)),   # resident centroids
                pl.BlockSpec((1, k_pad), lambda i: (0, 0)),
            ],
            out_specs=[
                pl.BlockSpec((tn_rows, k_pad), lambda i: (i, 0)),
                pl.BlockSpec((h_pad, k_pad), lambda i: (0, 0)),   # accumulator output
            ],
            scratch_shapes=[
                pltpu.VMEM((h_pad, k_pad), jnp.float32),
                pltpu.VMEM((1, k_pad), jnp.float32),
            ],
        ),
        compiler_params=pltpu.CompilerParams(
            dimension_semantics=("arbitrary",),   # grid axis reduces into C_new
            vmem_limit_bytes=_VMEM_LIMIT),
    )(x_pad, x2, rmask, c_t, c2)


# --------------------------------------------------------------------------- #
# Forward wrapper (pooling -> random init -> DKM while-loop)                   #
# --------------------------------------------------------------------------- #
@functools.partial(
    jax.jit,
    static_argnames=("k", "temp", "threshold", "max_iter", "eps", "tn_rows"))
def query_specific_clustering_forward(token_hidden, attention_mask, init_key, *,
                                      k, temp=0.5, threshold=1e-4, max_iter=100,
                                      eps=1e-6, tn_rows=256):
    """Returns (C, a): centroids (k, H) and soft assignments (N, k)."""
    n, seq_len, h = token_hidden.shape
    assert attention_mask.shape == (n, seq_len)

    tn_rows = min(tn_rows, _round_up(n, _SUBLANE))
    n_pad = _round_up(n, tn_rows)
    h_pad = _round_up(h, _LANE)
    k_pad = _round_up(k, _LANE)

    # Pad once so every tile is (8,128)-aligned and every store is lane-dense.
    # Token hidden states stay bf16 on the wire (halved DMA), upcast in-kernel.
    tok_p = jnp.zeros((n_pad, seq_len, h_pad), jnp.bfloat16)
    tok_p = tok_p.at[:n, :, :h].set(token_hidden.astype(jnp.bfloat16))
    mask_p = jnp.zeros((n_pad, seq_len), jnp.float32)
    mask_p = mask_p.at[:n, :].set(attention_mask.astype(jnp.float32))

    # sentence embeddings (f32 to limit Gram-trick cancellation) + ||x||^2
    x_pad, x2 = _masked_mean_pool(tok_p, mask_p, tn_rows)

    # centroid init: deterministic equivalent of random.sample(range(N), k)
    idx = jax.random.choice(init_key, n, shape=(k,), replace=False)
    c_t0 = jnp.zeros((h_pad, k_pad), jnp.float32).at[:, :k].set(x_pad[idx, :].T)

    rmask = (jnp.arange(n_pad) < n).astype(jnp.float32)[:, None]        # (n_pad, 1)
    pad_bias = jnp.where(jnp.arange(k_pad) < k, 0.0, 1e30)              # mask padded
    pad_bias = pad_bias.astype(jnp.float32)[None, :]                    # clusters

    def step(c_t):
        c2 = jnp.sum(c_t * c_t, axis=0, keepdims=True) + pad_bias       # (1, k_pad)
        return _dkm_step(x_pad, x2, rmask, c_t, c2,
                         temp=temp, eps=eps, tn_rows=tn_rows)

    a0, c_new0 = step(c_t0)
    diff0 = jnp.sum(jnp.abs(c_new0 - c_t0))

    def cond(state):
        _, _, _, diff, it = state
        return jnp.logical_and(diff > threshold, it < max_iter)

    def body(state):
        _, _, c_new_prev, _, it = state
        c_t = c_new_prev
        a, c_new = step(c_t)
        diff = jnp.sum(jnp.abs(c_new - c_t))
        return (c_t, a, c_new, diff, it + 1)

    init_state = (c_t0, a0, c_new0, diff0, jnp.int32(0))
    c_t, a_pad, _, _, _ = lax.while_loop(cond, body, init_state)

    centroids = c_t[:h, :k].T          # (k, H)  — same contract as torch self.C
    assignments = a_pad[:n, :k]        # (N, k)  — same contract as torch self.a
    return centroids, assignments


if __name__ == "__main__":
    # Small deterministic setup consistent with the module: N passages of up to
    # L tokens, word-embedding dim H, k clusters.
    N, L, H, VOCAB, K = 20, 16, 32, 100, 4

    key = jax.random.PRNGKey(0)
    k_table, k_ids, k_len, k_init = jax.random.split(key, 4)

    # TODO(synk): the pretrained HuggingFace transformer backbone inside
    # SentenceTransformer has no in-script equivalent; a deterministic embedding
    # lookup stands in for its token-level hidden states (bf16 backbone output).
    emb_table = (0.02 * jax.random.normal(k_table, (VOCAB, H))).astype(jnp.float32)
    token_ids = jax.random.randint(k_ids, (N, L), 0, VOCAB)
    lengths = jax.random.randint(k_len, (N,), 2, L + 1)
    attention_mask = (jnp.arange(L)[None, :] < lengths[:, None]).astype(jnp.float32)
    token_hidden = emb_table[token_ids].astype(jnp.bfloat16)            # (N, L, H)

    C, a = query_specific_clustering_forward(
        token_hidden, attention_mask, k_init, k=K, tn_rows=8)
    C, a = jax.block_until_ready((C, a))

    assert C.shape == (K, H) and a.shape == (N, K)
    assert bool(jnp.all(jnp.isfinite(C))) and bool(jnp.all(jnp.isfinite(a)))
    assert bool(jnp.all(jnp.abs(jnp.sum(a, axis=1) - 1.0) < 5e-2))
    print("KERNEL_OK")
</pallas_src>

<mosaic_0001>
module attributes {stable_mosaic.version = 11 : i64} {
  func.func @_dkm_step_kernel(%arg0: i32, %arg1: memref<8x128xf32, #tpu.memory_space<vmem>>, %arg2: memref<8x1xf32, #tpu.memory_space<vmem>>, %arg3: memref<8x1xf32, #tpu.memory_space<vmem>>, %arg4: memref<128x128xf32, #tpu.memory_space<vmem>>, %arg5: memref<1x128xf32, #tpu.memory_space<vmem>>, %arg6: memref<8x128xf32, #tpu.memory_space<vmem>>, %arg7: memref<128x128xf32, #tpu.memory_space<vmem>>, %arg8: memref<128x128xf32, #tpu.memory_space<vmem>>, %arg9: memref<1x128xf32, #tpu.memory_space<vmem>>) attributes {dimension_semantics = [#tpu.dimension_semantics<arbitrary>], iteration_bounds = array<i64: 3>, scalar_prefetch = 0 : i64, scratch_operands = 2 : i64, tpu.core_type = #tpu.core_type<tc>, window_params = [{transform_indices = @transform_0, window_bounds = array<i64: 8, 128>}, {transform_indices = @transform_1, window_bounds = array<i64: 8, 1>}, {transform_indices = @transform_2, window_bounds = array<i64: 8, 1>}, {pipeline_mode = #tpu.pipeline_mode<synchronous>, transform_indices = @transform_3, window_bounds = array<i64: 128, 128>}, {pipeline_mode = #tpu.pipeline_mode<synchronous>, transform_indices = @transform_4, window_bounds = array<i64: 1, 128>}, {transform_indices = @transform_5, window_bounds = array<i64: 8, 128>}, {pipeline_mode = #tpu.pipeline_mode<synchronous>, transform_indices = @transform_6, window_bounds = array<i64: 128, 128>}]} {
    %c0_i32 = arith.constant 0 : i32
    %0 = arith.cmpi eq, %arg0, %c0_i32 : i32
    %1 = arith.extui %0 : i1 to i32
    %c0_i32_0 = arith.constant 0 : i32
    %2 = arith.cmpi ne, %1, %c0_i32_0 : i32
    scf.if %2 {
      %cst_29 = arith.constant 0.000000e+00 : f32
      %47 = vector.broadcast %cst_29 : f32 to vector<128x128xf32>
      %c0_30 = arith.constant 0 : index
      %c0_31 = arith.constant 0 : index
      %48 = vector.load %arg8[%c0_30, %c0_31] : memref<128x128xf32, #tpu.memory_space<vmem>>, vector<128x128xf32>
      tpu.vector_store %arg8[%c0_30, %c0_31], %47 {strides = array<i32>} : memref<128x128xf32, #tpu.memory_space<vmem>>, vector<128x128xf32>,
      %cst_32 = arith.constant 0.000000e+00 : f32
      %49 = vector.broadcast %cst_32 : f32 to vector<1x128xf32>
      %c0_33 = arith.constant 0 : index
      %c0_34 = arith.constant 0 : index
      %50 = vector.load %arg9[%c0_33, %c0_34] : memref<1x128xf32, #tpu.memory_space<vmem>>, vector<1x128xf32>
      tpu.vector_store %arg9[%c0_33, %c0_34], %49 {strides = array<i32>} : memref<1x128xf32, #tpu.memory_space<vmem>>, vector<1x128xf32>,
    } else {
    }
    %c0 = arith.constant 0 : index
    %c0_1 = arith.constant 0 : index
    %3 = vector.load %arg1[%c0, %c0_1] : memref<8x128xf32, #tpu.memory_space<vmem>>, vector<8x128xf32>
    %c0_2 = arith.constant 0 : index
    %c0_3 = arith.constant 0 : index
    %4 = vector.load %arg2[%c0_2, %c0_3] : memref<8x1xf32, #tpu.memory_space<vmem>>, vector<8x1xf32>
    %c0_4 = arith.constant 0 : index
    %c0_5 = arith.constant 0 : index
    %5 = vector.load %arg3[%c0_4, %c0_5] : memref<8x1xf32, #tpu.memory_space<vmem>>, vector<8x1xf32>
    %c0_6 = arith.constant 0 : index
    %c0_7 = arith.constant 0 : index
    %6 = vector.load %arg4[%c0_6, %c0_7] : memref<128x128xf32, #tpu.memory_space<vmem>>, vector<128x128xf32>
    %c0_8 = arith.constant 0 : index
    %c0_9 = arith.constant 0 : index
    %7 = vector.load %arg5[%c0_8, %c0_9] : memref<1x128xf32, #tpu.memory_space<vmem>>, vector<1x128xf32>
    %cst = arith.constant dense<0.000000e+00> : vector<8x128xf32>
    %8 = tpu.matmul %3, %6, %cst {dimension_numbers = #tpu.dot_dimension_numbers<[1], [0], [0], [1], [0, 0, 1, 1], [], []>} : vector<8x128xf32>, vector<128x128xf32>, vector<8x128xf32> -> vector<8x128xf32>
    %9 = vector.broadcast %4 : vector<8x1xf32> to vector<8x128xf32>
    %10 = vector.broadcast %7 : vector<1x128xf32> to vector<8x128xf32>
    %11 = arith.addf %9, %10 : vector<8x128xf32>
    %cst_10 = arith.constant 2.000000e+00 : f32
    %12 = vector.broadcast %cst_10 : f32 to vector<8x128xf32>
    %13 = arith.mulf %12, %8 : vector<8x128xf32>
    %14 = arith.subf %11, %13 : vector<8x128xf32>
    %cst_11 = arith.constant 0.000000e+00 : f32
    %15 = vector.broadcast %cst_11 : f32 to vector<8x128xf32>
    %16 = arith.maximumf %14, %15 : vector<8x128xf32>
    %17 = math.sqrt %16 : vector<8x128xf32>
    %cst_12 = arith.constant 0.000000e+00 : f32
    %18 = vector.broadcast %cst_12 : f32 to vector<8x128xf32>
    %19 = arith.subf %18, %17 : vector<8x128xf32>
    %cst_13 = arith.constant 2.000000e+00 : f32
    %20 = vector.broadcast %cst_13 : f32 to vector<8x128xf32>
    %21 = arith.mulf %19, %20 : vector<8x128xf32>
    %cst_14 = arith.constant dense<0xFF800000> : vector<8xf32>
    %22 = vector.multi_reduction <maximumf>, %21, %cst_14 [1] : vector<8x128xf32> to vector<8xf32>
    %23 = vector.shape_cast %22 : vector<8xf32> to vector<8x1xf32>
    %24 = vector.broadcast %23 : vector<8x1xf32> to vector<8x128xf32>
    %25 = arith.subf %21, %24 : vector<8x128xf32>
    %26 = math.exp %25 : vector<8x128xf32>
    %cst_15 = arith.constant dense<0.000000e+00> : vector<8xf32>
    %27 = vector.multi_reduction <add>, %26, %cst_15 [1] : vector<8x128xf32> to vector<8xf32>
    %28 = vector.shape_cast %27 : vector<8xf32> to vector<8x1xf32>
    %29 = tpu.reciprocal %28 {approx = true} : vector<8x1xf32> -> vector<8x1xf32>
    %30 = vector.broadcast %29 : vector<8x1xf32> to vector<8x128xf32>
    %31 = arith.mulf %26, %30 : vector<8x128xf32>
    %32 = vector.broadcast %5 : vector<8x1xf32> to vector<8x128xf32>
    %33 = arith.mulf %31, %32 : vector<8x128xf32>
    %c0_16 = arith.constant 0 : index
    %c0_17 = arith.constant 0 : index
    %34 = vector.load %arg6[%c0_16, %c0_17] : memref<8x128xf32, #tpu.memory_space<vmem>>, vector<8x128xf32>
    tpu.vector_store %arg6[%c0_16, %c0_17], %33 {strides = array<i32>} : memref<8x128xf32, #tpu.memory_space<vmem>>, vector<8x128xf32>,
    %c0_18 = arith.constant 0 : index
    %c0_19 = arith.constant 0 : index
    %35 = vector.load %arg8[%c0_18, %c0_19] : memref<128x128xf32, #tpu.memory_space<vmem>>, vector<128x128xf32>
    %cst_20 = arith.constant dense<0.000000e+00> : vector<128x128xf32>
    %36 = tpu.matmul %3, %33, %cst_20 {dimension_numbers = #tpu.dot_dimension_numbers<[0], [0], [1], [1], [0, 1, 1, 1], [], []>} : vector<8x128xf32>, vector<8x128xf32>, vector<128x128xf32> -> vector<128x128xf32>
    %37 = arith.addf %35, %36 : vector<128x128xf32>
    %c0_21 = arith.constant 0 : index
    %c0_22 = arith.constant 0 : index
    %38 = vector.load %arg8[%c0_21, %c0_22] : memref<128x128xf32, #tpu.memory_space<vmem>>, vector<128x128xf32>
    tpu.vector_store %arg8[%c0_21, %c0_22], %37 {strides = array<i32>} : memref<128x128xf32, #tpu.memory_space<vmem>>, vector<128x128xf32>,
    %c0_23 = arith.constant 0 : index
    %c0_24 = arith.constant 0 : index
    %39 = vector.load %arg9[%c0_23, %c0_24] : memref<1x128xf32, #tpu.memory_space<vmem>>, vector<1x128xf32>
    %cst_25 = arith.constant dense<0.000000e+00> : vector<128xf32>
    %40 = vector.multi_reduction <add>, %33, %cst_25 [0] : vector<8x128xf32> to vector<128xf32>
    %41 = vector.shape_cast %40 : vector<128xf32> to vector<1x128xf32>
    %42 = arith.addf %39, %41 : vector<1x128xf32>
    %c0_26 = arith.constant 0 : index
    %c0_27 = arith.constant 0 : index
    %43 = vector.load %arg9[%c0_26, %c0_27] : memref<1x128xf32, #tpu.memory_space<vmem>>, vector<1x128xf32>
    tpu.vector_store %arg9[%c0_26, %c0_27], %42 {strides = array<i32>} : memref<1x128xf32, #tpu.memory_space<vmem>>, vector<1x128xf32>,
    %c2_i32 = arith.constant 2 : i32
    %44 = arith.cmpi eq, %arg0, %c2_i32 : i32
    %45 = arith.extui %44 : i1 to i32
    %c0_i32_28 = arith.constant 0 : i32
    %46 = arith.cmpi ne, %45, %c0_i32_28 : i32
    scf.if %46 {
      %c0_29 = arith.constant 0 : index
      %c0_30 = arith.constant 0 : index
      %47 = vector.load %arg8[%c0_29, %c0_30] : memref<128x128xf32, #tpu.memory_space<vmem>>, vector<128x128xf32>
      %c0_31 = arith.constant 0 : index
      %c0_32 = arith.constant 0 : index
      %48 = vector.load %arg9[%c0_31, %c0_32] : memref<1x128xf32, #tpu.memory_space<vmem>>, vector<1x128xf32>
      %cst_33 = arith.constant 9.99999997E-7 : f32
      %49 = vector.broadcast %cst_33 : f32 to vector<1x128xf32>
      %50 = arith.addf %48, %49 : vector<1x128xf32>
      %51 = vector.broadcast %50 : vector<1x128xf32> to vector<128x128xf32>
      %52 = arith.divf %47, %51 : vector<128x128xf32>
      %c0_34 = arith.constant 0 : index
      %c0_35 = arith.constant 0 : index
      %53 = vector.load %arg7[%c0_34, %c0_35] : memref<128x128xf32, #tpu.memory_space<vmem>>, vector<128x128xf32>
      tpu.vector_store %arg7[%c0_34, %c0_35], %52 {strides = array<i32>} : memref<128x128xf32, #tpu.memory_space<vmem>>, vector<128x128xf32>,
    } else {
    }
    return
  }
  func.func @transform_0(%arg0: i32) -> (i32, i32) {
    %c0_i32 = arith.constant 0 : i32
    %c0_i32_0 = arith.constant 0 : i32
    return %arg0, %c0_i32 : i32, i32
  }
  func.func @transform_1(%arg0: i32) -> (i32, i32) {
    %c0_i32 = arith.constant 0 : i32
    %c0_i32_0 = arith.constant 0 : i32
    return %arg0, %c0_i32 : i32, i32
  }
  func.func @transform_2(%arg0: i32) -> (i32, i32) {
    %c0_i32 = arith.constant 0 : i32
    %c0_i32_0 = arith.constant 0 : i32
    return %arg0, %c0_i32 : i32, i32
  }
  func.func @transform_3(%arg0: i32) -> (i32, i32) {
    %c0_i32 = arith.constant 0 : i32
    %c0_i32_0 = arith.constant 0 : i32
    %c0_i32_1 = arith.constant 0 : i32
    return %c0_i32, %c0_i32_0 : i32, i32
  }
  func.func @transform_4(%arg0: i32) -> (i32, i32) {
    %c0_i32 = arith.constant 0 : i32
    %c0_i32_0 = arith.constant 0 : i32
    %c0_i32_1 = arith.constant 0 : i32
    return %c0_i32, %c0_i32_0 : i32, i32
  }
  func.func @transform_5(%arg0: i32) -> (i32, i32) {
    %c0_i32 = arith.constant 0 : i32
    %c0_i32_0 = arith.constant 0 : i32
    return %arg0, %c0_i32 : i32, i32
  }
  func.func @transform_6(%arg0: i32) -> (i32, i32) {
    %c0_i32 = arith.constant 0 : i32
    %c0_i32_0 = arith.constant 0 : i32
    %c0_i32_1 = arith.constant 0 : i32
    return %c0_i32, %c0_i32_0 : i32, i32
  }
}

module attributes {stable_mosaic.version = 11 : i64} {
  func.func @_pool_kernel(%arg0: i32, %arg1: memref<8x16x128xbf16, #tpu.memory_space<vmem>>, %arg2: memref<8x16xf32, #tpu.memory_space<vmem>>, %arg3: memref<8x128xf32, #tpu.memory_space<vmem>>, %arg4: memref<8x1xf32, #tpu.memory_space<vmem>>) attributes {dimension_semantics = [#tpu.dimension_semantics<parallel>], iteration_bounds = array<i64: 3>, scalar_prefetch = 0 : i64, scratch_operands = 0 : i64, tpu.core_type = #tpu.core_type<tc>, window_params = [{transform_indices = @transform_0, window_bounds = array<i64: 8, 16, 128>}, {transform_indices = @transform_1, window_bounds = array<i64: 8, 16>}, {transform_indices = @transform_2, window_bounds = array<i64: 8, 128>}, {transform_indices = @transform_3, window_bounds = array<i64: 8, 1>}]} {
    %c0 = arith.constant 0 : index
    %c0_0 = arith.constant 0 : index
    %c0_1 = arith.constant 0 : index
    %0 = vector.load %arg1[%c0, %c0_0, %c0_1] : memref<8x16x128xbf16, #tpu.memory_space<vmem>>, vector<8x16x128xbf16>
    %1 = arith.extf %0 : vector<8x16x128xbf16> to vector<8x16x128xf32>
    %c0_2 = arith.constant 0 : index
    %c0_3 = arith.constant 0 : index
    %2 = vector.load %arg2[%c0_2, %c0_3] : memref<8x16xf32, #tpu.memory_space<vmem>>, vector<8x16xf32>
    %3 = vector.shape_cast %2 : vector<8x16xf32> to vector<8x16x1xf32>
    %4 = vector.broadcast %3 : vector<8x16x1xf32> to vector<8x16x128xf32>
    %5 = arith.mulf %1, %4 : vector<8x16x128xf32>
    %cst = arith.constant dense<0.000000e+00> : vector<8x128xf32>
    %6 = vector.multi_reduction <add>, %5, %cst [1] : vector<8x16x128xf32> to vector<8x128xf32>
    %cst_4 = arith.constant dense<0.000000e+00> : vector<8xf32>
    %7 = vector.multi_reduction <add>, %2, %cst_4 [1] : vector<8x16xf32> to vector<8xf32>
    %8 = vector.shape_cast %7 : vector<8xf32> to vector<8x1xf32>
    %cst_5 = arith.constant 9.99999971E-10 : f32
    %9 = vector.broadcast %cst_5 : f32 to vector<8x1xf32>
    %10 = arith.maximumf %8, %9 : vector<8x1xf32>
    %11 = tpu.reciprocal %10 {approx = true} : vector<8x1xf32> -> vector<8x1xf32>
    %12 = vector.broadcast %11 : vector<8x1xf32> to vector<8x128xf32>
    %13 = arith.mulf %6, %12 : vector<8x128xf32>
    %c0_6 = arith.constant 0 : index
    %c0_7 = arith.constant 0 : index
    %14 = vector.load %arg3[%c0_6, %c0_7] : memref<8x128xf32, #tpu.memory_space<vmem>>, vector<8x128xf32>
    tpu.vector_store %arg3[%c0_6, %c0_7], %13 {strides = array<i32>} : memref<8x128xf32, #tpu.memory_space<vmem>>, vector<8x128xf32>,
    %15 = arith.mulf %13, %13 : vector<8x128xf32>
    %cst_8 = arith.constant dense<0.000000e+00> : vector<8xf32>
    %16 = vector.multi_reduction <add>, %15, %cst_8 [1] : vector<8x128xf32> to vector<8xf32>
    %17 = vector.shape_cast %16 : vector<8xf32> to vector<8x1xf32>
    %c0_9 = arith.constant 0 : index
    %c0_10 = arith.constant 0 : index
    %18 = vector.load %arg4[%c0_9, %c0_10] : memref<8x1xf32, #tpu.memory_space<vmem>>, vector<8x1xf32>
    tpu.vector_store %arg4[%c0_9, %c0_10], %17 {strides = array<i32>} : memref<8x1xf32, #tpu.memory_space<vmem>>, vector<8x1xf32>,
    return
  }
  func.func @transform_0(%arg0: i32) -> (i32, i32, i32) {
    %c0_i32 = arith.constant 0 : i32
    %c0_i32_0 = arith.constant 0 : i32
    %c0_i32_1 = arith.constant 0 : i32
    return %arg0, %c0_i32, %c0_i32_0 : i32, i32, i32
  }
  func.func @transform_1(%arg0: i32) -> (i32, i32) {
    %c0_i32 = arith.constant 0 : i32
    %c0_i32_0 = arith.constant 0 : i32
    return %arg0, %c0_i32 : i32, i32
  }
  func.func @transform_2(%arg0: i32) -> (i32, i32) {
    %c0_i32 = arith.constant 0 : i32
    %c0_i32_0 = arith.constant 0 : i32
    return %arg0, %c0_i32 : i32, i32
  }
  func.func @transform_3(%arg0: i32) -> (i32, i32) {
    %c0_i32 = arith.constant 0 : i32
    %c0_i32_0 = arith.constant 0 : i32
    return %arg0, %c0_i32 : i32, i32
  }
}

</mosaic_0001>

<bundles_post_ra>
// kernel: query_specific_clustering_forward.2
= control target key start
LH: loop header
LB: loop body
LE: loop exit
PB: predicated region body
PF: predicated region fallthrough
CT: control target
= control target key end

     0   :  { %s678_s12 = smov 0   ;;  %s741_s0 = inlined_call_operand.vmem [shape: bf16[24,16,128], index: 0, kind: input, shape index: {}]   ;;  %s742_s1 = inlined_call_operand.vmem [shape: f32[24,16], index: 1, kind: input, shape index: {}]   ;;  %s743_s2 = inlined_call_operand.vmem [shape: f32[24,128], index: 2, kind: output, shape index: {0}]   ;;  %s744_s3 = inlined_call_operand.vmem [shape: f32[24,1], index: 3, kind: output, shape index: {1}]  }
   0x1 LB: > { %s684_s13 = sadd.s32 4294967295, %s656_s12   ;;  %p591_p0 = scmp.ge.s32.totalorder %s656_s12, 1  ;;  %s656_s12 = sphi %s678_s12, %s14_s12  }
   0x2   : > { %p151_p1 = scmp.lt.s32.totalorder %s656_s12, 4 }
   0x4   : > { %p152_p2 = pnand %p591_p0, %p151_p1 }
   0x5   : > { %p190_p3 = scmp.lt.s32.totalorder (!%p152_p2), %s684_s13, 2  ;;  %v235_v0 = vlaneseq (!%p152_p2)  ;;  %vm395_vm0 = vcmask (!%p152_p2), 130048   ;;  %s592_s19 = sshll.u32 (!%p152_p2), %s684_s13, 3  ;;  %vm434_vm1 = vcmask (!%p152_p2), 1041409   ;;  %vm437_vm2 = vcmask (!%p152_p2), 1042434  }
   0x6   : > { %155 = sbr.rel (%p152_p2) target bundleno = 348 (0x15c), region = 28  ;;  %p184_p4 = scmp.lt.s32.totalorder (!%p152_p2), %s592_s19, 23  ;;  %vm440_vm3 = vcmask (!%p152_p2), 1043459   ;;  %vm443_vm4 = vcmask (!%p152_p2), 1044484   ;;  %vm446_vm5 = vcmask (!%p152_p2), 1045509   ;;  %vm449_vm6 = vcmask (!%p152_p2), 1046534  }
   0x7   : > { %v236_v1 = vshrl.u32 (!%p152_p2), %v235_v0, 7  ;;  %vm452_vm7 = vcmask (!%p152_p2), 1047559   ;;  %vm489_vm8 = vcmask (!%p152_p2), 7168  }
   0x9   : > { %v248_v2 = vsub.s32 (!%p152_p2), 1, %v236_v1  ;;  %v259_v3 = vsub.s32 (!%p152_p2), 2, %v236_v1  ;;  %v237_v8 = vsub.s32 (!%p152_p2), 0, %v236_v1  ;;  %v270_v10 = vsub.s32 (!%p152_p2), 3, %v236_v1 }
   0xa   : > { %v281_v12 = vsub.s32 (!%p152_p2), 4, %v236_v1  ;;  %v292_v14 = vsub.s32 (!%p152_p2), 5, %v236_v1  ;;  %v303_v16 = vsub.s32 (!%p152_p2), 6, %v236_v1  ;;  %v314_v18 = vsub.s32 (!%p152_p2), 7, %v236_v1 }
   0xd   : > { %s191_s14 = scalar_select %p190_p3, %s684_s13, 2 }
   0xe   : > { %s746_s19 = smov (!%p184_p4, %s592_s19), 23 }
   0xf   : > { %s690_s15 = sshll.u32 %s191_s14, 3  ;;  %s600_s20 = sshll.u32 %s746_s19, 3 }
  0x10   : > { %s193_s18 = scalar_lea.vmem %s742_s1, %s690_s15  ;;  %s700_s23 = scalar_lea.vmem %s741_s0, %s600_s20 }
  0x11   : > { %v234_v4 = vld [vmem:[%s193_s18] sm:$0xff]  ;;  %v634_v24 = vld [vmem:[%s700_s23 + $0x10] sm:$0xff]   ;;  %v635_v31 = vld [vmem:[%s700_s23 + $0x18] sm:$0xff]   ;;  %s197_s26 = scalar_lea.vmem %s743_s2, %s690_s15  ;;  %s201_s29 = scalar_lea.vmem %s744_s3, %s690_s15 }
  0x12   : > { %v396_v5 = vsel %vm395_vm0, %v234_v4, 0.0  ;;  %v249_v6 = vrot.slane %v234_v4, %v248_v2  ;;  %v260_v7 = vrot.slane %v234_v4, %v259_v3  ;;  %v238_v9 = vrot.slane %v234_v4, %v237_v8  ;;  %v602_v25 = vld [vmem:[%s700_s23] sm:$0xff]   ;;  %v633_v40 = vld [vmem:[%s700_s23 + $0x8] sm:$0xff]  }
  0x13   : > { %397 = vadd.xlane.f32.xlu0 %v396_v5  ;;  %v271_v11 = vrot.slane %v234_v4, %v270_v10  ;;  %v282_v13 = vrot.slane %v234_v4, %v281_v12  ;;  %v293_v15 = vrot.slane %v234_v4, %v292_v14  ;;  %v304_v17 = vrot.slane %v234_v4, %v303_v16  ;;  %v636_v46 = vld [vmem:[%s700_s23 + $0x20] sm:$0xff]   ;;  %v637_v57 = vld [vmem:[%s700_s23 + $0x28] sm:$0xff]   ;;  %v638_v5 = vld [vmem:[%s700_s23 + $0x30] sm:$0xff]  }
  0x14   : > { %255 = vbcast.lane.b32.xlu1 %v249_v6, 264  ;;  %v315_v19 = vrot.slane %v234_v4, %v314_v18  ;;  %v611_v26 = vunpack.c.l.bf16 %v634_v24  ;;  %v612_v27 = vunpack.c.h.bf16 %v634_v24  ;;  %v603_v28 = vunpack.c.l.bf16 %v602_v25 }
  0x15   : > { %v604_v30 = vunpack.c.h.bf16 %v602_v25  ;;  %v615_v32 = vunpack.c.l.bf16 %v635_v31  ;;  %v616_v38 = vunpack.c.h.bf16 %v635_v31  ;;  %v608_v47 = vunpack.c.h.bf16 %v633_v40 }
  0x16   : > { %v607_v50 = vunpack.c.l.bf16 %v633_v40  ;;  %v620_v55 = vunpack.c.h.bf16 %v636_v46  ;;  %v619_v60 = vunpack.c.l.bf16 %v636_v46  ;;  %v624_v3 = vunpack.c.h.bf16 %v637_v57 }
  0x17   : > { %v623_v8 = vunpack.c.l.bf16 %v637_v57  ;;  %v628_v16 = vunpack.c.h.bf16 %v638_v5 }
  0x18   : > { %262 = vbcast.lane.b32.xlu1 %v260_v7, 256 }
  0x1c   : > { %266 = vbcast.lane.b32.xlu1 %v260_v7, 264 }
  0x20   : > { %240 = vbcast.lane.b32.xlu1 %v238_v9, 256 }
  0x24   : > { %244 = vbcast.lane.b32.xlu1 %v238_v9, 264 }
  0x28   : > { %273 = vbcast.lane.b32.xlu1 %v271_v11, 256 }
  0x29   : > { %251 = vbcast.lane.b32.xlu0 %v249_v6, 256 }
  0x2c   : > { %277 = vbcast.lane.b32.xlu1 %v271_v11, 264 }
  0x2d   : > { %284 = vbcast.lane.b32.xlu0 %v282_v13, 256 }
  0x30   : > { %288 = vbcast.lane.b32.xlu1 %v282_v13, 264 }
  0x31   : > { %295 = vbcast.lane.b32.xlu0 %v293_v15, 256 }
  0x34   : > { %299 = vbcast.lane.b32.xlu1 %v293_v15, 264 }
  0x35   : > { %306 = vbcast.lane.b32.xlu0 %v304_v17, 256 }
  0x38   : > { %310 = vbcast.lane.b32.xlu1 %v304_v17, 264 }
  0x39   : > { %317 = vbcast.lane.b32.xlu0 %v315_v19, 256 }
  0x3c   : > { %321 = vbcast.lane.b32.xlu1 %v315_v19, 264 }
  0x86   : > { %v256_v20 = vpop.permute.xlu1 %255 }
  0x87   : > { %v326_v58 = vmul.f32 %v608_v47, %v256_v20 }
  0x8a   : > { %v263_v21 = vpop.permute.xlu1 %262 }
  0x8b   : > { %v327_v33 = vmul.f32 %v611_v26, %v263_v21  ;;  %v627_v21 = vunpack.c.l.bf16 %v638_v5 }
  0x8e   : > { %v267_v22 = vpop.permute.xlu1 %266 }
  0x8f   : > { %v328_v34 = vmul.f32 %v612_v27, %v267_v22  ;;  %v639_v22 = vld [vmem:[%s700_s23 + $0x38] sm:$0xff]  }
  0x91   : > { %v353_v41 = vadd.f32 %v328_v34, %v327_v33  ;;  %v632_v33 = vunpack.c.h.bf16 %v639_v22 }
  0x92   : > { %v241_v23 = vpop.permute.xlu1 %240 }
  0x93   : > { %v323_v35 = vmul.f32 %v603_v28, %v241_v23  ;;  %v354_v51 = vrot.slane %v353_v41, 4 }
  0x95   : > { %v355_v61 = vadd.f32 %v354_v51, %v353_v41 }
  0x96   : > { %v245_v29 = vpop.permute.xlu1 %244 }
  0x97   : > { %v324_v36 = vmul.f32 %v604_v30, %v245_v29  ;;  %v356_v9 = vrot.slane %v355_v61, 2 }
  0x99   : > { %v339_v42 = vadd.f32 %v324_v36, %v323_v35  ;;  %v357_v23 = vadd.f32 %v356_v9, %v355_v61 }
  0x9a   : > { %v274_v37 = vpop.permute.xlu1 %273 }
  0x9b   : > { %v329_v39 = vmul.f32 %v615_v32, %v274_v37  ;;  %v340_v52 = vrot.slane %v339_v42, 4  ;;  %v631_v32 = vunpack.c.l.bf16 %v639_v22 }
  0x9d   : > { %v341_v62 = vadd.f32 %v340_v52, %v339_v42 }
  0x9e   : > { %v278_v43 = vpop.permute.xlu1 %277 }
  0x9f   : > { %v330_v44 = vmul.f32 %v616_v38, %v278_v43  ;;  %v342_v10 = vrot.slane %v341_v62, 2 }
  0xa0   : > { %v398_v45 = vpop.xlane.xlu0 %397 }
  0xa1   : > { %v360_v48 = vadd.f32 %v330_v44, %v329_v39  ;;  %v399_v49 = vmax.f32 %v398_v45, 1e-09  ;;  %v343_v24 = vadd.f32 %v342_v10, %v341_v62  ;;  %v358_v39 = vrot.slane %v357_v23, 1 }
  0xa2   : > { %v289_v53 = vpop.permute.xlu1 %288 }
  0xa3   : > { %v361_v54 = vrot.slane %v360_v48, 4  ;;  %648 = vrcp.f32 %v399_v49  ;;  %v332_v2 = vmul.f32 %v620_v55, %v289_v53  ;;  %v344_v40 = vrot.slane %v343_v24, 1 }
  0xa4   : > { %v252_v56 = vpop.permute.xlu0 %251 }
  0xa5   : > { %v325_v59 = vmul.f32 %v607_v50, %v252_v56  ;;  %v362_v63 = vadd.f32 %v361_v54, %v360_v48  ;;  %v359_v54 = vadd.f32 %v358_v39, %v357_v23  ;;  %v345_v56 = vadd.f32 %v344_v40, %v343_v24 }
  0xa6   : > { %v300_v0 = vpop.permute.xlu1 %299 }
  0xa7   : > { %v346_v1 = vadd.f32 %v326_v58, %v325_v59  ;;  %v363_v11 = vrot.slane %v362_v63, 2  ;;  %v334_v14 = vmul.f32 %v624_v3, %v300_v0 }
  0xa8   : > { %v285_v4 = vpop.permute.xlu0 %284 }
  0xa9   : > { %v347_v6 = vrot.slane %v346_v1, 4  ;;  %v331_v7 = vmul.f32 %v619_v60, %v285_v4  ;;  %v364_v25 = vadd.f32 %v363_v11, %v362_v63 }
  0xaa   : > { %v311_v15 = vpop.permute.xlu1 %310 }
  0xab   : > { %v348_v12 = vadd.f32 %v347_v6, %v346_v1  ;;  %v367_v13 = vadd.f32 %v332_v2, %v331_v7  ;;  %v336_v30 = vmul.f32 %v628_v16, %v311_v15  ;;  %v365_v41 = vrot.slane %v364_v25, 1 }
  0xac   : > { %v296_v17 = vpop.permute.xlu0 %295 }
  0xad   : > { %v349_v18 = vrot.slane %v348_v12, 2  ;;  %v368_v19 = vrot.slane %v367_v13, 4  ;;  %v333_v20 = vmul.f32 %v623_v8, %v296_v17  ;;  %v710_v26 = vpop.eup %648  ;;  %v366_v57 = vadd.f32 %v365_v41, %v364_v25 }
  0xae   : > { %v322_v38 = vpop.permute.xlu1 %321  ;;  %v402_v42 = vrot.slane %v710_v26, 1  ;;  %v403_v49 = vrot.slane %v710_v26, 2  ;;  %v404_v59 = vrot.slane %v710_v26, 3  ;;  %v417_v1 = vmul.f32 %v710_v26, %v345_v56 }
  0xaf   : > { %v350_v27 = vadd.f32 %v349_v18, %v348_v12  ;;  %v369_v28 = vadd.f32 %v368_v19, %v367_v13  ;;  %v374_v29 = vadd.f32 %v334_v14, %v333_v20  ;;  %v338_v48 = vmul.f32 %v632_v33, %v322_v38 }
  0xb0   : > { %v307_v31 = vpop.permute.xlu0 %306  ;;  %v419_v2 = vmul.f32 %v403_v49, %v359_v54  ;;  %v405_v6 = vrot.slane %v710_v26, 4  ;;  %v420_v8 = vmul.f32 %v404_v59, %v366_v57  ;;  %v406_v10 = vrot.slane %v710_v26, 5 }
  0xb1   : > { %v351_v34 = vrot.slane %v350_v27, 1  ;;  %v370_v35 = vrot.slane %v369_v28, 2  ;;  %v375_v36 = vrot.slane %v374_v29, 4  ;;  %v335_v37 = vmul.f32 %v627_v21, %v307_v31 }
  0xb2   : > { %v456_v14 = vmul.f32 %v417_v1, %v417_v1  ;;  %v458_v15 = vmul.f32 %v419_v2, %v419_v2  ;;  %v436_v20 = vrot.slane %v419_v2, 6  ;;  %v459_v21 = vmul.f32 %v420_v8, %v420_v8 }
  0xb3   : > { %v352_v43 = vadd.f32 %v351_v34, %v350_v27  ;;  %v371_v44 = vadd.f32 %v370_v35, %v369_v28  ;;  %v376_v45 = vadd.f32 %v375_v36, %v374_v29  ;;  %v381_v46 = vadd.f32 %v336_v30, %v335_v37 }
  0xb4   : > { %v318_v47 = vpop.permute.xlu0 %317  ;;  %v407_v24 = vrot.slane %v710_v26, 6  ;;  %v474_v28 = vrot.slane %v458_v15, 6  ;;  %v408_v35 = vrot.slane %v710_v26, 7  ;;  %v476_v37 = vrot.slane %v459_v21, 5 }
  0xb5   : > { %v418_v50 = vmul.f32 %v402_v42, %v352_v43  ;;  %v372_v51 = vrot.slane %v371_v44, 1  ;;  %v377_v52 = vrot.slane %v376_v45, 2  ;;  %v382_v53 = vrot.slane %v381_v46, 4 }
  0xb6   : > { %v337_v55 = vmul.f32 %v631_v32, %v318_v47  ;;  %v439_v32 = vrot.slane %v420_v8, 5 }
  0xb7   : > { %v378_v58 = vadd.f32 %v377_v52, %v376_v45  ;;  %v457_v60 = vmul.f32 %v418_v50, %v418_v50  ;;  %v383_v61 = vadd.f32 %v382_v53, %v381_v46  ;;  %v373_v63 = vadd.f32 %v372_v51, %v371_v44 }
  0xb8   : > { %v388_v62 = vadd.f32 %v338_v48, %v337_v55  ;;  %v433_v3 = vrot.slane %v418_v50, 7 }
  0xb9   : > { %v379_v0 = vrot.slane %v378_v58, 1  ;;  %v384_v4 = vrot.slane %v383_v61, 2  ;;  %v472_v9 = vrot.slane %v457_v60, 7  ;;  %v421_v13 = vmul.f32 %v405_v6, %v373_v63 }
  0xba   : > { %v389_v5 = vrot.slane %v388_v62, 4  ;;  %v435_v19 = vsel %vm434_vm1, %v433_v3, %v417_v1 }
  0xbb   : > { %v380_v7 = vadd.f32 %v379_v0, %v378_v58  ;;  %v385_v11 = vadd.f32 %v384_v4, %v383_v61  ;;  %v473_v25 = vsel %vm434_vm1, %v472_v9, %v456_v14  ;;  %v460_v27 = vmul.f32 %v421_v13, %v421_v13 }
  0xbc   : > { %v390_v12 = vadd.f32 %v389_v5, %v388_v62  ;;  %v438_v29 = vsel %vm437_vm2, %v436_v20, %v435_v19  ;;  %v442_v34 = vrot.slane %v421_v13, 4  ;;  %v475_v36 = vsel %vm437_vm2, %v474_v28, %v473_v25 }
  0xbd   : > { %v422_v16 = vmul.f32 %v406_v10, %v380_v7  ;;  %v386_v17 = vrot.slane %v385_v11, 1  ;;  %v441_v41 = vsel %vm440_vm3, %v439_v32, %v438_v29  ;;  %v478_v43 = vrot.slane %v460_v27, 4 }
  0xbe   : > { %v391_v18 = vrot.slane %v390_v12, 2  ;;  %v477_v45 = vsel %vm440_vm3, %v476_v37, %v475_v36  ;;  %v444_v47 = vsel %vm443_vm4, %v442_v34, %v441_v41 }
  0xbf   : > { %v387_v22 = vadd.f32 %v386_v17, %v385_v11  ;;  %v461_v33 = vmul.f32 %v422_v16, %v422_v16  ;;  %v445_v38 = vrot.slane %v422_v16, 3  ;;  %v479_v51 = vsel %vm443_vm4, %v478_v43, %v477_v45 }
  0xc0   : > { %v392_v23 = vadd.f32 %v391_v18, %v390_v12 }
  0xc1   : > { %v423_v31 = vmul.f32 %v407_v24, %v387_v22  ;;  %v480_v46 = vrot.slane %v461_v33, 3  ;;  %v447_v50 = vsel %vm446_vm5, %v445_v38, %v444_v47 }
  0xc2   : > { %v393_v30 = vrot.slane %v392_v23, 1 }
  0xc3   : > { %v462_v40 = vmul.f32 %v423_v31, %v423_v31  ;;  %v448_v42 = vrot.slane %v423_v31, 2  ;;  %v481_v53 = vsel %vm446_vm5, %v480_v46, %v479_v51 }
  0xc4   : > { %v394_v39 = vadd.f32 %v393_v30, %v392_v23 }
  0xc5   : > { %v482_v26 = vrot.slane %v462_v40, 2  ;;  %v450_v52 = vsel %vm449_vm6, %v448_v42, %v447_v50 }
  0xc6   : > { %v424_v44 = vmul.f32 %v408_v35, %v394_v39 }
  0xc7   : > { %v483_v56 = vsel %vm449_vm6, %v482_v26, %v481_v53 }
  0xc8   : > { %v451_v48 = vrot.slane %v424_v44, 1  ;;  %v463_v49 = vmul.f32 %v424_v44, %v424_v44 }
  0xca   : > { %v484_v54 = vrot.slane %v463_v49, 1  ;;  %v453_v55 = vsel %vm452_vm7, %v451_v48, %v450_v52 }
  0xcb   : > { %455 = vst [vmem:[%s197_s26] sm:$0xff] %v453_v55 }
  0xcc   : > { %v485_v57 = vsel %vm452_vm7, %v484_v54, %v483_v56 }
  0xcd   : > { %487 = vadd.xlane.f32.xlu0 %v485_v57 }
 0x15a   : > { %v488_v58 = vpop.xlane.xlu0 %487 }
 0x15b   : > { %490 = vst.msk [vmem:[%s201_s29] sm:$0xff] %vm489_vm8, %v488_v58 }
 0x15c PF: > { %s14_s12 = sadd.s32 1, %s656_s12  }
 0x15d   : > { %p11_p5 = scmp.ge.s32.totalorder %s14_s12, 5  }
 0x15f   :  { %13 = sbr.rel (!%p11_p5) target bundleno = 1 (0x1), region = 73 }

// kernel: query_specific_clustering_forward.3
= control target key start
LH: loop header
LB: loop body
LE: loop exit
PB: predicated region body
PF: predicated region fallthrough
CT: control target
= control target key end

     0   :  { %12 = vsyncpa [#allocation5], 0  ;;  %s1434_s0 = inlined_call_operand.vmem [shape: f32[24,128], index: 0, kind: input, shape index: {}]   ;;  %s1435_s1 = inlined_call_operand.vmem [shape: f32[24,1], index: 1, kind: input, shape index: {}]   ;;  %s1436_s2 = inlined_call_operand.vmem [shape: f32[24,1], index: 2, kind: input, shape index: {}]   ;;  %s1437_s3 = inlined_call_operand.vmem [shape: f32[128,128], index: 3, kind: input, shape index: {}]   ;;  %s1438_s4 = inlined_call_operand.vmem [shape: f32[1,128], index: 4, kind: input, shape index: {}]   ;;  %s1439_s5 = inlined_call_operand.hbm [shape: f32[24,128], index: 5, kind: output, shape index: {0}]   ;;  %s1440_s6 = inlined_call_operand.vmem [shape: f32[128,128], index: 6, kind: output, shape index: {1}]  }
   0x1   :  { %14 = vsyncpa [#allocation5 + $0x1], 0  ;;  %s1186_s21 = smov 0   ;;  %s1188_s22 = smov 0  }
   0x2   :  { %s1190_s23 = smov 0   ;;  %s1192_s24 = smov 0  }
   0x3 LB: > { %s1207_s25 = sadd.s32 4294967295, %s1143_s24   ;;  %s877_s26 = sadd.s32 4294967294, %s1143_s24   ;;  %s1143_s24 = sphi %s1192_s24, %s1448_s24   ;;  %s1139_s23 = sphi %s1190_s23, %s1447_s23   ;;  %s1135_s22 = sphi %s1188_s22, %s1446_s22   ;;  %s1131_s21 = sphi %s1186_s21, %s1445_s21  }
   0x4   : > { %s1211_s27 = sadd.s32 1, %s1143_s24   ;;  %s147_s28 = sadd.s32 1, %s1139_s23 }
   0x5   : > { %s144_s29 = ssub.s32 %s1143_s24, %s1211_s27  ;;  %p157_p0 = scmp.ne.s32.totalorder %s1139_s23, %s1135_s22 }
   0x6   : > { %p145_p1 = scmp.eq.s32.totalorder %s144_s29, 0  ;;  %p158_p2 = scmp.eq.s32.totalorder %s1207_s25, 2 }
   0x7   : > { %p163_p3 = scmp.ne.s32.totalorder %s1135_s22, %s1131_s21  ;;  %p164_p4 = scmp.eq.s32.totalorder %s877_s26, 2 }
   0x8   : > { %s1222_s30 = scalar_select %p145_p1, %s1139_s23, %s147_s28  }
   0x9   : > { %p1224_p5 = por %p158_p2, %p157_p0  ;;  %p1228_p6 = por %p164_p4, %p163_p3 }
   0xa   : > { %p880_p7 = scmp.ge.s32.totalorder %s1143_s24, 1  ;;  %p230_p8 = scmp.lt.s32.totalorder %s1143_s24, 4 }
   0xc   : > { %p231_p9 = pnand %p880_p7, %p230_p8 }
   0xd   : > { %s1441_s9 = sand.u32 (!%p231_p9), 1, %s1135_s22   ;;  %p267_p10 = scmp.lt.s32.totalorder (!%p231_p9), %s1207_s25, 2 }
   0xe   : > { %234 = sbr.rel (%p231_p9) target bundleno = 958 (0x3be), region = 40  ;;  %s1238_s10 = sshll.u32 (!%p231_p9), %s1441_s9, 3 }
   0xf   : > { %s264_s28 = scalar_lea.vmem (!%p231_p9), [#allocation4], %s1238_s10  ;;  %p885_p11 = scmp.ne.s32.totalorder (!%p231_p9), %s1207_s25, 0 }
  0x15   : > { %s268_s11 = scalar_select %p267_p10, %s1207_s25, 2 }
  0x16   : > { %282 = sbr.rel (%p885_p11) target bundleno = 32 (0x20), region = 44  ;;  %v1145_v0 = vmov (!%p885_p11), 0.0  }
  0x17   : > { %s1241_s12 = sshll.u32 %s268_s11, 3  ;;  %283 = vst [vmem:[#allocation2] sm:$0xff] (!%p885_p11), %v1145_v0  ;;  %284 = vst [vmem:[#allocation2 + $0x8] sm:$0xff] (!%p885_p11), %v1145_v0 }
  0x18   : > { %s270_s15 = scalar_lea.vmem %s1434_s0, %s1241_s12  ;;  %s274_s18 = scalar_lea.vmem %s1435_s1, %s1241_s12  ;;  %285 = vst [vmem:[#allocation2 + $0x10] sm:$0xff] (!%p885_p11), %v1145_v0  ;;  %286 = vst [vmem:[#allocation2 + $0x18] sm:$0xff] (!%p885_p11), %v1145_v0 }
  0x19   : > { %s278_s26 = scalar_lea.vmem %s1436_s2, %s1241_s12  ;;  %287 = vst [vmem:[#allocation2 + $0x20] sm:$0xff] (!%p885_p11), %v1145_v0  ;;  %288 = vst [vmem:[#allocation2 + $0x28] sm:$0xff] (!%p885_p11), %v1145_v0 }
  0x1a   : > { %289 = vst [vmem:[#allocation2 + $0x30] sm:$0xff] (!%p885_p11), %v1145_v0  ;;  %290 = vst [vmem:[#allocation2 + $0x38] sm:$0xff] (!%p885_p11), %v1145_v0 }
  0x1b   : > { %291 = vst [vmem:[#allocation2 + $0x40] sm:$0xff] (!%p885_p11), %v1145_v0  ;;  %292 = vst [vmem:[#allocation2 + $0x48] sm:$0xff] (!%p885_p11), %v1145_v0 }
  0x1c   : > { %293 = vst [vmem:[#allocation2 + $0x50] sm:$0xff] (!%p885_p11), %v1145_v0  ;;  %294 = vst [vmem:[#allocation2 + $0x58] sm:$0xff] (!%p885_p11), %v1145_v0 }
  0x1d   : > { %295 = vst [vmem:[#allocation2 + $0x60] sm:$0xff] %v1145_v0  ;;  %296 = vst [vmem:[#allocation2 + $0x68] sm:$0xff] %v1145_v0 }
  0x1e   : > { %297 = vst [vmem:[#allocation2 + $0x70] sm:$0xff] %v1145_v0  ;;  %298 = vst [vmem:[#allocation2 + $0x78] sm:$0xff] %v1145_v0 }
  0x1f   : > { %299 = vst [vmem:[#allocation3] sm:$0x1] %v1145_v0 }
  0x20 PF: > { %v303_v1 = vld [vmem:[%s1437_s3] sm:$0xff]  ;;  %v304_v2 = vld [vmem:[%s1437_s3 + $0x8] sm:$0xff]  ;;  %v305_v3 = vld [vmem:[%s1437_s3 + $0x10] sm:$0xff]  ;;  %v1146_v4 = vmov 0.0|0.0   ;;  %vm1147_vm0 = vmmov 0   ;;  %v1148_v7 = vmov 0.0  }
  0x21   : > { %1003 = vmatprep.subr.bf16.mxu0 %v1146_v4  ;;  %v1004_v5 = vpack.c.bf16 %v304_v2, %v303_v1  ;;  %v306_v6 = vld [vmem:[%s1437_s3 + $0x18] sm:$0xff]  ;;  %974 = vmatprep.mubr.msk.f32.mxu0 %vm1147_vm0, %v1148_v7  ;;  %v1149_v8 = vmov 0   ;;  %v307_v10 = vld [vmem:[%s1437_s3 + $0x20] sm:$0xff]  ;;  %v308_v11 = vld [vmem:[%s1437_s3 + $0x28] sm:$0xff]  ;;  %vm478_vm3 = vcmask 64512   ;;  %p903_p12 = scmp.ne.s32.totalorder %s1207_s25, 2 }
  0x22   : > { %1071 = vset.pattern.permute.xlu0 %v1149_v8  ;;  %1072 = vset.pattern.permute.xlu1 %v1149_v8  ;;  %v1007_v9 = vpack.c.bf16 %v306_v6, %v305_v3  ;;  %v301_v12 = vld [vmem:[%s274_s18] sm:$0xff]  ;;  %v1010_v13 = vpack.c.bf16 %v308_v11, %v307_v10  ;;  %v309_v14 = vld [vmem:[%s1437_s3 + $0x30] sm:$0xff]  ;;  %v310_v15 = vld [vmem:[%s1437_s3 + $0x38] sm:$0xff] }
  0x23   : > { %1005 = vmatpush3.bf16.msra.mxu0 %v1004_v5  ;;  %392 = vperm.xlu0 %1071, %v301_v12   ;;  %v1013_v16 = vpack.c.bf16 %v310_v15, %v309_v14  ;;  %v311_v17 = vld [vmem:[%s1437_s3 + $0x40] sm:$0xff]  ;;  %v312_v18 = vld [vmem:[%s1437_s3 + $0x48] sm:$0xff]  ;;  %v313_v20 = vld [vmem:[%s1437_s3 + $0x50] sm:$0xff] }
  0x24   : > { %1006 = vmatprep.subr.bf16.mxu0 %v1146_v4  ;;  %v1016_v19 = vpack.c.bf16 %v312_v18, %v311_v17  ;;  %v314_v21 = vld [vmem:[%s1437_s3 + $0x58] sm:$0xff]  ;;  %v315_v23 = vld [vmem:[%s1437_s3 + $0x60] sm:$0xff]  ;;  %v316_v24 = vld [vmem:[%s1437_s3 + $0x68] sm:$0xff] }
  0x25   : > { %v1019_v22 = vpack.c.bf16 %v314_v21, %v313_v20  ;;  %v1022_v25 = vpack.c.bf16 %v316_v24, %v315_v23  ;;  %v317_v26 = vld [vmem:[%s1437_s3 + $0x70] sm:$0xff]  ;;  %v318_v27 = vld [vmem:[%s1437_s3 + $0x78] sm:$0xff]  ;;  %v300_v29 = vld [vmem:[%s270_s15] sm:$0xff] }
  0x26   : > { %v1025_v28 = vpack.c.bf16 %v318_v27, %v317_v26  ;;  %v886_v30 = vld [vmem:[%s1438_s4] ss:$0 sm:$0xff]  ;;  %v431_v15 = vld [vmem:[#allocation2 + $0x8] sm:$0xff]  ;;  %v433_v21 = vld [vmem:[#allocation2 + $0x18] sm:$0xff] }
  0x27   : > { %1008 = vmatpush3.bf16.msra.mxu0 %v1007_v9  ;;  %v302_v49 = vld [vmem:[%s278_s26] sm:$0xff]  ;;  %v435_v27 = vld [vmem:[#allocation2 + $0x28] sm:$0xff] }
  0x28   : > { %1009 = vmatprep.subr.bf16.mxu0 %v1146_v4  ;;  %v704_v60 = vld [vmem:[#allocation3] sm:$0x1] }
  0x2b   : > { %1011 = vmatpush3.bf16.msra.mxu0 %v1010_v13 }
  0x2c   : > { %1012 = vmatprep.subr.bf16.mxu0 %v1146_v4 }
  0x2f   : > { %1014 = vmatpush3.bf16.msra.mxu0 %v1013_v16  ;;  %v430_v16 = vld [vmem:[#allocation2] sm:$0xff] }
  0x30   : > { %1015 = vmatprep.subr.bf16.mxu0 %v1146_v4 }
  0x33   : > { %1017 = vmatpush3.bf16.msra.mxu0 %v1016_v19 }
  0x34   : > { %1018 = vmatprep.subr.bf16.mxu0 %v1146_v4 }
  0x37   : > { %1020 = vmatpush3.bf16.msra.mxu0 %v1019_v22  ;;  %v432_v22 = vld [vmem:[#allocation2 + $0x10] sm:$0xff] }
  0x38   : > { %1021 = vmatprep.subr.bf16.mxu0 %v1146_v4 }
  0x3b   : > { %1023 = vmatpush3.bf16.msra.mxu0 %v1022_v25 }
  0x3c   : > { %1024 = vmatprep.subr.bf16.mxu0 %v1146_v4 }
  0x3f   : > { %1026 = vmatpush3.bf16.msra.mxu0 %v1025_v28  ;;  %v434_v28 = vld [vmem:[#allocation2 + $0x20] sm:$0xff] }
  0x42   : > { %975 = vmatmul.mubr.f32.vlgmr.msra.gmra.mrb[0].mxu0 %v300_v29 }
  0xa2   : > { %v393_v31 = vpop.permute.xlu0 %392 }
  0xa3   : > { %v401_v32 = vadd.f32 %v886_v30, %v393_v31 }
 0x115   : > { %v386_v33 = vpop.f32.mrb[0].mxu0 }
 0x116   : > { %v402_v34 = vmul.f32 2.0, %v386_v33  ;;  %v976_v35 = vpop.f32.mrb[1].mxu0  ;;  %v437_v33 = vld [vmem:[#allocation2 + $0x38] sm:$0xff] }
 0x118   : > { %v403_v36 = vsub.f32 %v401_v32, %v402_v34  ;;  %v436_v34 = vld [vmem:[#allocation2 + $0x30] sm:$0xff] }
 0x11a   : > { %v404_v37 = vmax.f32 %v403_v36, 0.0 }
 0x11c   : > { %1073 = vrsqrt.f32 %v404_v37  ;;  %vm407_vm1 = vcmp.eq.f32.partialorder %v404_v37, inf  ;;  %v410_v40 = vand.u32 2147483648, %v404_v37  ;;  %vm409_vm2 = vcmp.eq.f32.partialorder %v404_v37, 0.0 }
 0x126   : > { %v1074_v38 = vpop.eup %1073 }
 0x127   : > { %v406_v39 = vmul.f32 %v1074_v38, %v404_v37 }
 0x129   : > { %v408_v41 = vsel %vm407_vm1, %v404_v37, %v406_v39  ;;  %v439_v39 = vld [vmem:[#allocation2 + $0x48] sm:$0xff] }
 0x12a   : > { %v411_v42 = vsel %vm409_vm2, %v410_v40, %v408_v41  ;;  %v438_v40 = vld [vmem:[#allocation2 + $0x40] sm:$0xff] }
 0x12b   : > { %v412_v43 = vsub.f32 0.0, %v411_v42 }
 0x12d   : > { %v413_v44 = vmul.f32 2.0, %v412_v43 }
 0x12f   : > { %414 = vmax.xlane.f32.xlu0 %v413_v44 }
 0x1bc   : > { %v415_v45 = vpop.xlane.xlu0 %414 }
 0x1bd   : > { %v416_v46 = vsub.f32 %v413_v44, %v415_v45  ;;  %v441_v45 = vld [vmem:[#allocation2 + $0x58] sm:$0xff] }
 0x1bf   : > { %v417_v47 = vmul.f32 1.442695, %v416_v46  ;;  %v440_v46 = vld [vmem:[#allocation2 + $0x50] sm:$0xff] }
 0x1c1   : > { %1075 = vpow2.f32 %v417_v47 }
 0x1cb   : > { %v1076_v48 = vpop.eup %1075 }
 0x1cc   : > { %419 = vadd.xlane.f32.xlu1 %v1076_v48 }
 0x1dd   : > { %425 = vperm.xlu1 %1072, %v302_v49  }
 0x206   : > { %446 = vxpose.xlu1.b32.start.end [1/1] (short) %v300_v29, 128 }
 0x259   : > { %v420_v50 = vpop.xlane.xlu1 %419 }
 0x25a   : > { %1077 = vrcp.f32 %v420_v50 }
 0x25d   : > { %v426_v53 = vpop.permute.xlu1 %425 }
 0x264   : > { %v1078_v51 = vpop.eup %1077 }
 0x265   : > { %v422_v52 = vmul.f32 %v1078_v51, %v1076_v48  ;;  %v443_v51 = vld [vmem:[#allocation2 + $0x68] sm:$0xff] }
 0x267   : > { %v428_v54 = vmul.f32 %v426_v53, %v422_v52  ;;  %v442_v52 = vld [vmem:[#allocation2 + $0x60] sm:$0xff] }
 0x269   : > { %429 = vst [vmem:[%s264_s28] sm:$0xff] %v428_v54  ;;  %v705_v55 = vrot.slane %v428_v54, 4  ;;  %977 = vmatprep.subr.mxu1 %v428_v54 }
 0x26a   : > { %978 = vmatpush3.msra.mxu1 %v428_v54 }
 0x26b   : > { %v706_v56 = vadd.f32 %v705_v55, %v428_v54 }
 0x26d   : > { %v707_v57 = vrot.slane %v706_v56, 2 }
 0x26f   : > { %v708_v58 = vadd.f32 %v707_v57, %v706_v56  ;;  %v445_v57 = vld [vmem:[#allocation2 + $0x78] sm:$0xff] }
 0x271   : > { %v709_v59 = vrot.slane %v708_v58, 1 }
 0x273   : > { %v710_v61 = vadd.f32 %v709_v59, %v708_v58  ;;  %v444_v58 = vld [vmem:[#allocation2 + $0x70] sm:$0xff] }
 0x275   : > { %v711_v62 = vadd.f32 %v710_v61, %v704_v60 }
 0x277   : > { %712 = vst [vmem:[#allocation3] sm:$0x1] %v711_v62 }
 0x286   : > { %v462_v63 = vpop.trf.xlu1 }
 0x287   : > { %979 = vmatprep.mubr.msk.f32.mxu1 %vm478_vm3, %v462_v63  ;;  %v733_v63 = vld [vmem:[#allocation3] sm:$0x1] (!%p903_p12) }
 0x28a   : > { %v463_v0 = vpop.trf.xlu1 }
 0x28b   : > { %980 = vmatmul.mubr.msk.f32.vlgmr.msra.gmra.mrb[0].mxu1 %vm478_vm3, %v463_v0  ;;  %v736_v0 = vlaneseq (!%p903_p12) }
 0x28e   : > { %v464_v1 = vpop.trf.xlu1 }
 0x28f   : > { %982 = vmatprep.mubr.msk.f32.mxu1 %vm478_vm3, %v464_v1  ;;  %v734_v1 = vadd.f32 (!%p903_p12), 1e-06, %v733_v63 }
 0x292   : > { %v465_v2 = vpop.trf.xlu1 }
 0x293   : > { %983 = vmatmul.mubr.msk.f32.gmra.mrb[2].mxu1 %vm478_vm3, %v465_v2  ;;  %v737_v2 = vshrl.u32 (!%p903_p12), %v736_v0, 7 }
 0x296   : > { %v466_v3 = vpop.trf.xlu1 }
 0x297   : > { %985 = vmatprep.mubr.msk.f32.mxu1 %vm478_vm3, %v466_v3  ;;  %v738_v3 = vsub.s32 (!%p903_p12), 0, %v737_v2 }
 0x29a   : > { %v467_v4 = vpop.trf.xlu1 }
 0x29b   : > { %986 = vmatmul.mubr.msk.f32.gmra.mrb[4].mxu1 %vm478_vm3, %v467_v4  ;;  %v739_v4 = vrot.slane (!%p903_p12), %v734_v1, %v738_v3 }
 0x29d   : > { %1079 = vrcp.f32 (!%p903_p12), %v739_v4 }
 0x29e   : > { %v468_v5 = vpop.trf.xlu1 }
 0x29f   : > { %988 = vmatprep.mubr.msk.f32.mxu1 %vm478_vm3, %v468_v5 }
 0x2a2   : > { %v469_v6 = vpop.trf.xlu1 }
 0x2a3   : > { %989 = vmatmul.mubr.msk.f32.gmra.mrb[6].mxu1 %vm478_vm3, %v469_v6 }
 0x2a6   : > { %v470_v7 = vpop.trf.xlu1 }
 0x2a7   : > { %991 = vmatprep.mubr.msk.f32.mxu1 %vm478_vm3, %v470_v7 }
 0x2aa   : > { %v471_v8 = vpop.trf.xlu1 }
 0x2ab   : > { %992 = vmatmul.mubr.msk.f32.gmra.mrb[8].mxu1 %vm478_vm3, %v471_v8 }
 0x2ae   : > { %v472_v9 = vpop.trf.xlu1 }
 0x2af   : > { %994 = vmatprep.mubr.msk.f32.mxu1 %vm478_vm3, %v472_v9 }
 0x2b2   : > { %v473_v10 = vpop.trf.xlu1 }
 0x2b3   : > { %995 = vmatmul.mubr.msk.f32.gmra.mrb[10].mxu1 %vm478_vm3, %v473_v10 }
 0x2b6   : > { %v474_v11 = vpop.trf.xlu1 }
 0x2b7   : > { %997 = vmatprep.mubr.msk.f32.mxu1 %vm478_vm3, %v474_v11 }
 0x2ba   : > { %v475_v12 = vpop.trf.xlu1 }
 0x2bb   : > { %998 = vmatmul.mubr.msk.f32.gmra.mrb[12].mxu1 %vm478_vm3, %v475_v12 }
 0x2be   : > { %v476_v13 = vpop.trf.xlu1 }
 0x2bf   : > { %1000 = vmatprep.mubr.msk.f32.mxu1 %vm478_vm3, %v476_v13 }
 0x2c2   : > { %v477_v14 = vpop.trf.xlu1 }
 0x2c3   : > { %1001 = vmatmul.mubr.msk.f32.gmra.mrb[14].mxu1 %vm478_vm3, %v477_v14 }
 0x35e   : > { %v981_v17 = vpop.f32.mrb[0].mxu1 }
 0x35f   : > { %v673_v18 = vadd.f32 %v981_v17, %v431_v15  ;;  %v593_v19 = vpop.f32.mrb[1].mxu1  ;;  %v1080_v15 = vpop.eup (!%p903_p12), %1079 }
 0x360   : > { %v672_v20 = vadd.f32 %v593_v19, %v430_v16 }
 0x361   : > { %689 = vst [vmem:[#allocation2 + $0x8] sm:$0xff] %v673_v18 }
 0x362   : > { %688 = vst [vmem:[#allocation2] sm:$0xff] %v672_v20 }
 0x366   : > { %v984_v23 = vpop.f32.mrb[2].mxu1 }
 0x367   : > { %v675_v24 = vadd.f32 %v984_v23, %v433_v21  ;;  %v603_v25 = vpop.f32.mrb[3].mxu1 }
 0x368   : > { %v674_v26 = vadd.f32 %v603_v25, %v432_v22  ;;  %v718_v6 = vld [vmem:[#allocation2 + $0x8] sm:$0xff] (!%p903_p12) }
 0x369   : > { %691 = vst [vmem:[#allocation2 + $0x18] sm:$0xff] %v675_v24  ;;  %v717_v5 = vld [vmem:[#allocation2] sm:$0xff] (!%p903_p12)  ;;  %v743_v20 = vmul.f32 (!%p903_p12), %v1080_v15, %v718_v6 }
 0x36a   : > { %690 = vst [vmem:[#allocation2 + $0x10] sm:$0xff] %v674_v26  ;;  %v742_v19 = vmul.f32 (!%p903_p12), %v1080_v15, %v717_v5 }
 0x36b   : > { %759 = vst [vmem:[%s1440_s6 + $0x8] sm:$0xff] (!%p903_p12), %v743_v20 }
 0x36c   : > { %758 = vst [vmem:[%s1440_s6] sm:$0xff] (!%p903_p12), %v742_v19 }
 0x36e   : > { %v987_v29 = vpop.f32.mrb[4].mxu1 }
 0x36f   : > { %v677_v30 = vadd.f32 %v987_v29, %v435_v27  ;;  %v613_v31 = vpop.f32.mrb[5].mxu1 }
 0x370   : > { %v676_v32 = vadd.f32 %v613_v31, %v434_v28  ;;  %v720_v8 = vld [vmem:[#allocation2 + $0x18] sm:$0xff] (!%p903_p12) }
 0x371   : > { %693 = vst [vmem:[#allocation2 + $0x28] sm:$0xff] %v677_v30  ;;  %v719_v7 = vld [vmem:[#allocation2 + $0x10] sm:$0xff] (!%p903_p12)  ;;  %v745_v22 = vmul.f32 (!%p903_p12), %v1080_v15, %v720_v8 }
 0x372   : > { %692 = vst [vmem:[#allocation2 + $0x20] sm:$0xff] %v676_v32  ;;  %v744_v21 = vmul.f32 (!%p903_p12), %v1080_v15, %v719_v7 }
 0x373   : > { %761 = vst [vmem:[%s1440_s6 + $0x18] sm:$0xff] (!%p903_p12), %v745_v22 }
 0x374   : > { %760 = vst [vmem:[%s1440_s6 + $0x10] sm:$0xff] (!%p903_p12), %v744_v21 }
 0x376   : > { %v990_v35 = vpop.f32.mrb[6].mxu1 }
 0x377   : > { %v679_v36 = vadd.f32 %v990_v35, %v437_v33  ;;  %v623_v37 = vpop.f32.mrb[7].mxu1 }
 0x378   : > { %v678_v38 = vadd.f32 %v623_v37, %v436_v34  ;;  %v722_v10 = vld [vmem:[#allocation2 + $0x28] sm:$0xff] (!%p903_p12) }
 0x379   : > { %695 = vst [vmem:[#allocation2 + $0x38] sm:$0xff] %v679_v36  ;;  %v721_v9 = vld [vmem:[#allocation2 + $0x20] sm:$0xff] (!%p903_p12)  ;;  %v747_v27 = vmul.f32 (!%p903_p12), %v1080_v15, %v722_v10 }
 0x37a   : > { %694 = vst [vmem:[#allocation2 + $0x30] sm:$0xff] %v678_v38  ;;  %v746_v26 = vmul.f32 (!%p903_p12), %v1080_v15, %v721_v9 }
 0x37b   : > { %763 = vst [vmem:[%s1440_s6 + $0x28] sm:$0xff] (!%p903_p12), %v747_v27 }
 0x37c   : > { %762 = vst [vmem:[%s1440_s6 + $0x20] sm:$0xff] (!%p903_p12), %v746_v26 }
 0x37e   : > { %v993_v41 = vpop.f32.mrb[8].mxu1 }
 0x37f   : > { %v681_v42 = vadd.f32 %v993_v41, %v439_v39  ;;  %v633_v43 = vpop.f32.mrb[9].mxu1 }
 0x380   : > { %v680_v44 = vadd.f32 %v633_v43, %v438_v40  ;;  %v724_v12 = vld [vmem:[#allocation2 + $0x38] sm:$0xff] (!%p903_p12) }
 0x381   : > { %697 = vst [vmem:[#allocation2 + $0x48] sm:$0xff] %v681_v42  ;;  %v723_v11 = vld [vmem:[#allocation2 + $0x30] sm:$0xff] (!%p903_p12)  ;;  %v749_v29 = vmul.f32 (!%p903_p12), %v1080_v15, %v724_v12 }
 0x382   : > { %696 = vst [vmem:[#allocation2 + $0x40] sm:$0xff] %v680_v44  ;;  %v748_v28 = vmul.f32 (!%p903_p12), %v1080_v15, %v723_v11 }
 0x383   : > { %765 = vst [vmem:[%s1440_s6 + $0x38] sm:$0xff] (!%p903_p12), %v749_v29 }
 0x384   : > { %764 = vst [vmem:[%s1440_s6 + $0x30] sm:$0xff] (!%p903_p12), %v748_v28 }
 0x386   : > { %v996_v47 = vpop.f32.mrb[10].mxu1 }
 0x387   : > { %v683_v48 = vadd.f32 %v996_v47, %v441_v45  ;;  %v643_v49 = vpop.f32.mrb[11].mxu1 }
 0x388   : > { %v682_v50 = vadd.f32 %v643_v49, %v440_v46  ;;  %v726_v14 = vld [vmem:[#allocation2 + $0x48] sm:$0xff] (!%p903_p12) }
 0x389   : > { %699 = vst [vmem:[#allocation2 + $0x58] sm:$0xff] %v683_v48  ;;  %v725_v13 = vld [vmem:[#allocation2 + $0x40] sm:$0xff] (!%p903_p12)  ;;  %v751_v31 = vmul.f32 (!%p903_p12), %v1080_v15, %v726_v14 }
 0x38a   : > { %698 = vst [vmem:[#allocation2 + $0x50] sm:$0xff] %v682_v50  ;;  %v750_v30 = vmul.f32 (!%p903_p12), %v1080_v15, %v725_v13 }
 0x38b   : > { %767 = vst [vmem:[%s1440_s6 + $0x48] sm:$0xff] (!%p903_p12), %v751_v31 }
 0x38c   : > { %766 = vst [vmem:[%s1440_s6 + $0x40] sm:$0xff] (!%p903_p12), %v750_v30 }
 0x38e   : > { %v999_v53 = vpop.f32.mrb[12].mxu1 }
 0x38f   : > { %v685_v54 = vadd.f32 %v999_v53, %v443_v51  ;;  %v653_v55 = vpop.f32.mrb[13].mxu1 }
 0x390   : > { %v684_v56 = vadd.f32 %v653_v55, %v442_v52  ;;  %v728_v17 = vld [vmem:[#allocation2 + $0x58] sm:$0xff] (!%p903_p12) }
 0x391   : > { %701 = vst [vmem:[#allocation2 + $0x68] sm:$0xff] %v685_v54  ;;  %v727_v16 = vld [vmem:[#allocation2 + $0x50] sm:$0xff] (!%p903_p12)  ;;  %v753_v33 = vmul.f32 (!%p903_p12), %v1080_v15, %v728_v17 }
 0x392   : > { %700 = vst [vmem:[#allocation2 + $0x60] sm:$0xff] %v684_v56  ;;  %v752_v32 = vmul.f32 (!%p903_p12), %v1080_v15, %v727_v16 }
 0x393   : > { %769 = vst [vmem:[%s1440_s6 + $0x58] sm:$0xff] (!%p903_p12), %v753_v33 }
 0x394   : > { %716 = sbr.rel (%p903_p12) target bundleno = 933 (0x3a5), region = 48  ;;  %768 = vst [vmem:[%s1440_s6 + $0x50] sm:$0xff] (!%p903_p12), %v752_v32 }
 0x396   : > { %v1002_v59 = vpop.f32.mrb[14].mxu1 }
 0x397   : > { %v687_v60 = vadd.f32 %v1002_v59, %v445_v57  ;;  %v663_v61 = vpop.f32.mrb[15].mxu1 }
 0x398   : > { %v686_v62 = vadd.f32 %v663_v61, %v444_v58  ;;  %v730_v23 = vld [vmem:[#allocation2 + $0x68] sm:$0xff] (!%p903_p12) }
 0x399   : > { %703 = vst [vmem:[#allocation2 + $0x78] sm:$0xff] %v687_v60  ;;  %v729_v18 = vld [vmem:[#allocation2 + $0x60] sm:$0xff] (!%p903_p12)  ;;  %v755_v35 = vmul.f32 (!%p903_p12), %v1080_v15, %v730_v23 }
 0x39a   : > { %702 = vst [vmem:[#allocation2 + $0x70] sm:$0xff] %v686_v62  ;;  %v754_v34 = vmul.f32 (!%p903_p12), %v1080_v15, %v729_v18 }
 0x39b   : > { %771 = vst [vmem:[%s1440_s6 + $0x68] sm:$0xff] %v755_v35 }
 0x39c   : > { %770 = vst [vmem:[%s1440_s6 + $0x60] sm:$0xff] %v754_v34 }
 0x3a0   : > { %v732_v25 = vld [vmem:[#allocation2 + $0x78] sm:$0xff] }
 0x3a1   : > { %v731_v24 = vld [vmem:[#allocation2 + $0x70] sm:$0xff]  ;;  %v757_v37 = vmul.f32 %v1080_v15, %v732_v25 }
 0x3a2   : > { %v756_v36 = vmul.f32 %v1080_v15, %v731_v24 }
 0x3a3   : > { %773 = vst [vmem:[%s1440_s6 + $0x78] sm:$0xff] %v757_v37 }
 0x3a4   : > { %772 = vst [vmem:[%s1440_s6 + $0x70] sm:$0xff] %v756_v36 }
 0x3a5 PF: > { %s905_s17 = sshll.u32 %s1207_s25, 7  ;;  %s788_s29 = sshll.u32 %s264_s28, 4  ;;  %s789_s29 = int_to_ptr.vmem [resolvable:$true] %s788_s29 }
 0x3a6   : > { %s1394_s20 = scalar_lea.hbm %s1439_s5, %s905_s17  ;;  %s1444_s15 = sand.u32 1, %s1135_s22  }
 0x3a7   : > { %s775_s11 = scalar_lea.sflag [#allocation5], %s1444_s15  ;;  %s1081_s12 = scalar_lea.vmem %s789_s29, 128 }
 0x3a8   : > { %p1082_p13 = scmp.ne.s32.totalorder %s789_s29, %s1081_s12  ;;  %s1150_s26 = smov [#allocation4]  }
 0x3a9   : > { %s1085_s13 = sshll.u32 %s1150_s26, 4  ;;  %s1086_s13 = int_to_ptr.vmem [resolvable:$false] %s1085_s13 }
 0x3aa   : > { %p1083_p0 = pnand %p1082_p13, %p1224_p5  ;;  %s1087_s18 = scalar_lea.vmem %s1086_s13, 256 }
 0x3ab   : > { %p1088_p2 = scmp.lt.s32.totalorder %s789_s29, %s1086_s13  ;;  %p1089_p3 = scmp.lt.s32.totalorder %s1087_s18, %s1081_s12 }
 0x3ac   : > { %p1084_p1 = pneg %p1083_p0 }
 0x3ad   : > { %p1090_p4 = por %p1089_p3, %p1088_p2 }
 0x3af   : > { %p1091_p7 = pnand %p1090_p4, %p1084_p1 }
 0x3b1   : > { %1094 = shalt.err (!%p1091_p7)
}
 0x3b2   : > { %s1095_s25 = scalar_lea.hbm %s1394_s20, 128  ;;  %s1099_s14 = scalar_lea.hbm %s1439_s5, 384 }
 0x3b3   : > { %p1096_p8 = scmp.ne.s32.totalorder %s1394_s20, %s1095_s25  ;;  %p1100_p11 = scmp.lt.u32.totalorder %s1394_s20, %s1439_s5 }
 0x3b4   : > { %p1101_p12 = scmp.lt.u32.totalorder %s1099_s14, %s1095_s25  ;;  %p1103_p0 = scmp.lt.u32.totalorder %s1095_s25, %s1394_s20 }
 0x3b5   : > { %p1097_p9 = pnand %p1096_p8, %p1224_p5 }
 0x3b6   : > { %p1102_p13 = por %p1101_p12, %p1100_p11 }
 0x3b7   : > { %p1098_p10 = pneg %p1097_p9 }
 0x3b8   : > { %p1104_p1 = por %p1103_p0, %p1102_p13 }
 0x3ba   : > { %p1105_p2 = pnand %p1104_p1, %p1098_p10 }
 0x3bc   : > { %1108 = shalt.err (!%p1105_p2)
}
 0x3bd   : > { %1027 = dma.vmem_to_hbm [thread:$0]  (%p1224_p5), %s789_s29, 128, %s1394_s20, %s775_s11  }
 0x3be PF: > { %p1033_p3 = scmp.ge.s32.totalorder %s1143_s24, 2  ;;  %s806_s9 = sand.u32 1, %s1131_s21  }
 0x3bf   : > { %s807_s19 = scalar_lea.sflag [#allocation5], %s806_s9 }
 0x3c0   : > { %p1030_p4 = pnand %p1033_p3, %p1228_p6 }
 0x3c2   : > { %1126 = dma.done.wait (!%p1030_p4), %s807_s19, 128  }
 0x3c3   : > { %1128 = vsyncadd (!%p1030_p4), %s807_s19, 4294967168  ;;  %p17_p7 = scmp.ge.s32.totalorder %s1211_s27, 5   ;;  %s1445_s21 = smov %s1135_s22 }
 0x3c4   : > { %s1446_s22 = smov %s1139_s23  ;;  %s1447_s23 = smov %s1222_s30 }
 0x3c5   : > { %s1448_s24 = smov %s1211_s27  ;;  %19 = sbr.rel (!%p17_p7) target bundleno = 3 (0x3), region = 97 }
 0x3cc   :  { %812 = vsyncpa [#allocation5], 1 }
 0x3cd   :  { %814 = vsyncpa [#allocation5 + $0x1], 1 }

</bundles_post_ra>
